<compile_context>
chip_gen: v5e
topology: v5e:2x2
jax: 0.10.0
libtpu: 0.0.40
codegen_flags: <defaults>
</compile_context>

<pallas_src>
import numpy as np
import jax
import jax.numpy as jnp
from jax.experimental import pallas as pl
from jax.experimental.pallas import tpu as pltpu


def _round_up(n: int, m: int) -> int:
    return ((n + m - 1) // m) * m


def _pick_tile(dim: int, block: int, align: int):
    """Pick a tile size: multiple of `align`, <= block, dividing the padded dim.

    Returns (tile, padded_dim) with padded_dim % tile == 0 and
    padded_dim == round_up(dim, align) (i.e. no over-padding beyond alignment).
    """
    padded = _round_up(max(dim, 1), align)
    t = max(align, min(_round_up(block, align), padded))
    while padded % t != 0:
        t -= align
    return t, padded


def _vmem_limit_bytes() -> int:
    """~75% of this generation's VMEM (128 MiB v5e/v6e, 64 MiB per-TC v7x)."""
    try:
        cap = int(pltpu.get_tpu_info().vmem_capacity_bytes)
    except Exception:
        cap = 64 * 1024 * 1024      # conservative fallback (v7x per-TC)
    return max(32 * 1024 * 1024, (cap * 3) // 4)


# ---------------- per-step kernel: plain tiled matmul + bias -----------------

def _matmul_bias_kernel(x_ref, w_ref, b_ref, o_ref, acc_ref):
    k = pl.program_id(2)

    @pl.when(k == 0)
    def _():
        acc_ref[...] = jnp.zeros_like(acc_ref)

    # (TB, TK) x (TK, TO) -> f32 accumulator; no transpose anywhere.
    acc_ref[...] += jnp.dot(x_ref[...], w_ref[...],
                            preferred_element_type=jnp.float32)

    @pl.when(k == pl.num_programs(2) - 1)
    def _():
        o_ref[...] = (acc_ref[...] + b_ref[...]).astype(o_ref.dtype)


# ---------------- once-per-reset_noise combine (amortized) -------------------

def prepare_noisy_params(weight_mu, weight_sigma, eps_in, eps_out,
                         bias_mu, bias_sigma, *,
                         block_o: int = 512, block_k: int = 2048,
                         param_dtype=jnp.float32):
    """Combine mu/sigma/eps ONCE (per reset_noise) into effective weights.

    Stores W_eff transposed (Ip, Op), tile-aligned, so the per-step forward is
    a plain matmul+bias with half the weight HBM traffic and no per-call
    padding of the O×I tensors.  Use param_dtype=jnp.bfloat16 on v6e/v7x to
    halve weight bytes again (loosen the reference tolerance accordingly).
    """
    O, I = weight_mu.shape
    TO, Op = _pick_tile(O, block_o, 128)
    TK, Ip = _pick_tile(I, block_k, 128)

    # Rank-1 noise combined once; cost amortizes over all forwards until the
    # next reset_noise.
    w_eff = weight_mu + weight_sigma * (eps_out[:, None] * eps_in[None, :])
    b_eff = bias_mu + bias_sigma * eps_out

    w_t = jnp.pad(w_eff.T, ((0, Ip - I), (0, Op - O))).astype(param_dtype)   # (Ip, Op)
    b_p = jnp.pad(b_eff.reshape(1, O), ((0, 0), (0, Op - O))).astype(jnp.float32)

    return dict(w_t=w_t, bias=b_p, num_inputs=I, num_outputs=O, TO=TO, TK=TK)


# ---------------- per-step forward -------------------------------------------

def noisy_layer_forward(x, prepared, *, block_b: int = 256):
    """x: (B, num_inputs) -> (B, num_outputs), matching NoisyLayer.forward."""
    w_t = prepared["w_t"]
    bias = prepared["bias"]
    I = prepared["num_inputs"]
    O = prepared["num_outputs"]
    TO = prepared["TO"]
    TK = prepared["TK"]
    Ip, Op = w_t.shape

    B = x.shape[0]
    TB, Bp = _pick_tile(B, block_b, 8)

    xp = x
    if (Bp, Ip) != (B, I):
        xp = jnp.pad(x, ((0, Bp - B), (0, Ip - I)))
    xp = xp.astype(w_t.dtype)

    grid = (Bp // TB, Op // TO, Ip // TK)   # reduction (K) axis last

    out_p = pl.pallas_call(
        _matmul_bias_kernel,
        out_shape=jax.ShapeDtypeStruct((Bp, Op), x.dtype),
        grid_spec=pltpu.PrefetchScalarGridSpec(
            num_scalar_prefetch=0,
            grid=grid,
            in_specs=[
                pl.BlockSpec((TB, TK), lambda b, o, k: (b, k)),   # x
                pl.BlockSpec((TK, TO), lambda b, o, k: (k, o)),   # W_eff^T
                pl.BlockSpec((1, TO), lambda b, o, k: (0, o)),    # bias
            ],
            out_specs=pl.BlockSpec((TB, TO), lambda b, o, k: (b, o)),
            scratch_shapes=[pltpu.VMEM((TB, TO), jnp.float32)],
        ),
        compiler_params=pltpu.CompilerParams(
            dimension_semantics=("parallel", "parallel", "arbitrary"),
            vmem_limit_bytes=_vmem_limit_bytes(),
        ),
    )(xp, w_t, bias)

    return out_p[:B, :O]


# ---------------- init (deterministic re-implementation of the module) -------

def factorized_noise(key, size):
    """sign(x) * sqrt(|x|) for x ~ N(0, 1)."""
    x = jax.random.normal(key, (size,), dtype=jnp.float32)
    return jnp.sign(x) * jnp.sqrt(jnp.abs(x))


def init_noisy_layer_params(key, num_inputs, num_outputs, std_init=0.5):
    """NoisyLayer.init_params + reset_noise, keeping eps factored (rank-1)."""
    k_wmu, k_bmu, k_ein, k_eout = jax.random.split(key, 4)
    mu_range = 1.0 / np.sqrt(num_inputs)

    weight_mu = jax.random.uniform(k_wmu, (num_outputs, num_inputs),
                                   minval=-mu_range, maxval=mu_range,
                                   dtype=jnp.float32)
    weight_sigma = jnp.full((num_outputs, num_inputs),
                            std_init * mu_range, dtype=jnp.float32)
    bias_mu = jax.random.uniform(k_bmu, (num_outputs,),
                                 minval=-mu_range, maxval=mu_range,
                                 dtype=jnp.float32)
    bias_sigma = jnp.full((num_outputs,),
                          std_init / np.sqrt(num_outputs), dtype=jnp.float32)

    eps_in = factorized_noise(k_ein, num_inputs)
    eps_out = factorized_noise(k_eout, num_outputs)

    return dict(weight_mu=weight_mu, weight_sigma=weight_sigma,
                eps_in=eps_in, eps_out=eps_out,
                bias_mu=bias_mu, bias_sigma=bias_sigma,
                bias_epsilon=eps_out)


if __name__ == "__main__":
    key = jax.random.PRNGKey(0)
    k_params, k_x = jax.random.split(key)

    batch = 8
    num_inputs = 32
    num_outputs = 64

    params = init_noisy_layer_params(k_params, num_inputs, num_outputs,
                                     std_init=0.5)
    x = jax.random.normal(k_x, (batch, num_inputs), dtype=jnp.float32)

    # Combine once (per reset_noise) ...
    prepared = prepare_noisy_params(
        params["weight_mu"], params["weight_sigma"],
        params["eps_in"], params["eps_out"],
        params["bias_mu"], params["bias_sigma"])

    # ... then the per-step forward is a plain tiled matmul+bias Pallas kernel.
    out = noisy_layer_forward(x, prepared)
    out = jax.block_until_ready(out)

    # Reference (same math as F.linear with the materialized weight_epsilon).
    weight_epsilon = jnp.outer(params["eps_out"], params["eps_in"])
    w = params["weight_mu"] + params["weight_sigma"] * weight_epsilon
    b = params["bias_mu"] + params["bias_sigma"] * params["bias_epsilon"]
    ref = x @ w.T + b
    np.testing.assert_allclose(np.asarray(out), np.asarray(ref),
                               rtol=1e-5, atol=1e-5)

    print("KERNEL_OK")
</pallas_src>

<mosaic_0001>
module attributes {stable_mosaic.version = 11 : i64} {
  func.func @_matmul_bias_kernel(%arg0: i32, %arg1: i32, %arg2: i32, %arg3: memref<8x128xf32, #tpu.memory_space<vmem>>, %arg4: memref<128x128xf32, #tpu.memory_space<vmem>>, %arg5: memref<1x128xf32, #tpu.memory_space<vmem>>, %arg6: memref<8x128xf32, #tpu.memory_space<vmem>>, %arg7: memref<8x128xf32, #tpu.memory_space<vmem>>) attributes {dimension_semantics = [#tpu.dimension_semantics<parallel>, #tpu.dimension_semantics<parallel>, #tpu.dimension_semantics<arbitrary>], iteration_bounds = array<i64: 1, 1, 1>, scalar_prefetch = 0 : i64, scratch_operands = 1 : i64, tpu.core_type = #tpu.core_type<tc>, window_params = [{transform_indices = @transform_0, window_bounds = array<i64: 8, 128>}, {transform_indices = @transform_1, window_bounds = array<i64: 128, 128>}, {transform_indices = @transform_2, window_bounds = array<i64: 1, 128>}, {transform_indices = @transform_3, window_bounds = array<i64: 8, 128>}]} {
    %c0_i32 = arith.constant 0 : i32
    %0 = arith.cmpi eq, %arg2, %c0_i32 : i32
    %1 = arith.extui %0 : i1 to i32
    %c0_i32_0 = arith.constant 0 : i32
    %2 = arith.cmpi ne, %1, %c0_i32_0 : i32
    scf.if %2 {
      %cst_10 = arith.constant 0.000000e+00 : f32
      %12 = vector.broadcast %cst_10 : f32 to vector<8x128xf32>
      %c0_11 = arith.constant 0 : index
      %c0_12 = arith.constant 0 : index
      %13 = vector.load %arg7[%c0_11, %c0_12] : memref<8x128xf32, #tpu.memory_space<vmem>>, vector<8x128xf32>
      tpu.vector_store %arg7[%c0_11, %c0_12], %12 {strides = array<i32>} : memref<8x128xf32, #tpu.memory_space<vmem>>, vector<8x128xf32>,
    } else {
    }
    %c0 = arith.constant 0 : index
    %c0_1 = arith.constant 0 : index
    %3 = vector.load %arg7[%c0, %c0_1] : memref<8x128xf32, #tpu.memory_space<vmem>>, vector<8x128xf32>
    %c0_2 = arith.constant 0 : index
    %c0_3 = arith.constant 0 : index
    %4 = vector.load %arg3[%c0_2, %c0_3] : memref<8x128xf32, #tpu.memory_space<vmem>>, vector<8x128xf32>
    %c0_4 = arith.constant 0 : index
    %c0_5 = arith.constant 0 : index
    %5 = vector.load %arg4[%c0_4, %c0_5] : memref<128x128xf32, #tpu.memory_space<vmem>>, vector<128x128xf32>
    %cst = arith.constant dense<0.000000e+00> : vector<8x128xf32>
    %6 = tpu.matmul %4, %5, %cst {dimension_numbers = #tpu.dot_dimension_numbers<[1], [0], [0], [1], [0, 0, 1, 1], [], []>} : vector<8x128xf32>, vector<128x128xf32>, vector<8x128xf32> -> vector<8x128xf32>
    %7 = arith.addf %3, %6 : vector<8x128xf32>
    %c0_6 = arith.constant 0 : index
    %c0_7 = arith.constant 0 : index
    %8 = vector.load %arg7[%c0_6, %c0_7] : memref<8x128xf32, #tpu.memory_space<vmem>>, vector<8x128xf32>
    tpu.vector_store %arg7[%c0_6, %c0_7], %7 {strides = array<i32>} : memref<8x128xf32, #tpu.memory_space<vmem>>, vector<8x128xf32>,
    %c0_i32_8 = arith.constant 0 : i32
    %9 = arith.cmpi eq, %arg2, %c0_i32_8 : i32
    %10 = arith.extui %9 : i1 to i32
    %c0_i32_9 = arith.constant 0 : i32
    %11 = arith.cmpi ne, %10, %c0_i32_9 : i32
    scf.if %11 {
      %c0_10 = arith.constant 0 : index
      %c0_11 = arith.constant 0 : index
      %12 = vector.load %arg7[%c0_10, %c0_11] : memref<8x128xf32, #tpu.memory_space<vmem>>, vector<8x128xf32>
      %c0_12 = arith.constant 0 : index
      %c0_13 = arith.constant 0 : index
      %13 = vector.load %arg5[%c0_12, %c0_13] : memref<1x128xf32, #tpu.memory_space<vmem>>, vector<1x128xf32>
      %14 = vector.broadcast %13 : vector<1x128xf32> to vector<8x128xf32>
      %15 = arith.addf %12, %14 : vector<8x128xf32>
      %c0_14 = arith.constant 0 : index
      %c0_15 = arith.constant 0 : index
      %16 = vector.load %arg6[%c0_14, %c0_15] : memref<8x128xf32, #tpu.memory_space<vmem>>, vector<8x128xf32>
      tpu.vector_store %arg6[%c0_14, %c0_15], %15 {strides = array<i32>} : memref<8x128xf32, #tpu.memory_space<vmem>>, vector<8x128xf32>,
    } else {
    }
    return
  }
  func.func @transform_0(%arg0: i32, %arg1: i32, %arg2: i32) -> (i32, i32) {
    %c0_i32 = arith.constant 0 : i32
    return %arg0, %arg2 : i32, i32
  }
  func.func @transform_1(%arg0: i32, %arg1: i32, %arg2: i32) -> (i32, i32) {
    %c0_i32 = arith.constant 0 : i32
    return %arg2, %arg1 : i32, i32
  }
  func.func @transform_2(%arg0: i32, %arg1: i32, %arg2: i32) -> (i32, i32) {
    %c0_i32 = arith.constant 0 : i32
    %c0_i32_0 = arith.constant 0 : i32
    return %c0_i32, %arg1 : i32, i32
  }
  func.func @transform_3(%arg0: i32, %arg1: i32, %arg2: i32) -> (i32, i32) {
    %c0_i32 = arith.constant 0 : i32
    return %arg0, %arg1 : i32, i32
  }
}

</mosaic_0001>

<bundles_post_ra>
// kernel: tpu_custom_call.1
= control target key start
LH: loop header
LB: loop body
LE: loop exit
PB: predicated region body
PF: predicated region fallthrough
CT: control target
= control target key end

     0   :  { %8 = vsyncpa [#allocation4], 0  ;;  %s239_s0 = inlined_call_operand.hbm [shape: f32[8,128], index: 0, kind: input, shape index: {}]   ;;  %s240_s1 = inlined_call_operand.hbm [shape: f32[128,128], index: 1, kind: input, shape index: {}]   ;;  %s241_s2 = inlined_call_operand.vmem [shape: f32[1,128], index: 2, kind: input, shape index: {}]   ;;  %s242_s3 = inlined_call_operand.hbm [shape: f32[8,128], index: 3, kind: output, shape index: {}]  }
   0x1   :  { %9 = vsyncpa [#allocation7], 0 }
   0x2   :  { %10 = vsyncpa [#allocation5], 0  ;;  %s16_s14 = sshll.u32 %s239_s0, 4  ;;  %s202_s15 = smov [#allocation3]   ;;  %s17_s14 = int_to_ptr.hbm [resolvable:$true] %s16_s14 }
   0x3   :  { %s18_s16 = sshll.u32 %s202_s15, 4  ;;  %s26_s19 = sshll.u32 %s240_s1, 4  ;;  %s19_s16 = int_to_ptr.vmem [resolvable:$true] %s18_s16  ;;  %s27_s19 = int_to_ptr.hbm [resolvable:$true] %s26_s19 }
   0x4   :  { %21 = dma.hbm_to_vmem [thread:$0]  %s17_s14, 128, %s19_s16, [#allocation4]  }
   0x5   :  { %s203_s20 = smov [#allocation6]   ;;  %s204_s22 = smov 128  }
   0x6   :  { %s28_s21 = sshll.u32 %s203_s20, 4  ;;  %s205_s23 = smov 8   ;;  %s29_s21 = int_to_ptr.vmem [resolvable:$true] %s28_s21 }
   0x7   :  { %34 = dma.hbm_to_vmem [thread:$0]  %s27_s19, 2048, %s29_s21, [#allocation7], %s204_s22, %s204_s22, %s205_s23  }
   0x8   :  { %196 = dma.done.wait [#allocation4], 128  }
   0x9   :  { %197 = vsyncadd [#allocation4], 4294967168 }
   0xa   :  { %198 = dma.done.wait [#allocation7], 2048  }
   0xb   :  { %199 = vsyncadd [#allocation7], 4294965248  ;;  %v67_v0 = vld [vmem:[#allocation6 + $0x78] sm:$0xff]  ;;  %v66_v1 = vld [vmem:[#allocation6 + $0x70] sm:$0xff]  ;;  %s206_s24 = smov [#allocation8]   ;;  %s107_s28 = sshll.u32 %s242_s3, 4  ;;  %s108_s28 = int_to_ptr.hbm [resolvable:$true] %s107_s28 }
   0xc   :  { %68 = vmatpush.msra.mxu0 %v67_v0  ;;  %v65_v2 = vld [vmem:[#allocation6 + $0x68] sm:$0xff]  ;;  %v64_v3 = vld [vmem:[#allocation6 + $0x60] sm:$0xff]  ;;  %v63_v4 = vld [vmem:[#allocation6 + $0x58] sm:$0xff]  ;;  %s105_s25 = sshll.u32 %s206_s24, 4  ;;  %s106_s25 = int_to_ptr.vmem [resolvable:$true] %s105_s25 }
   0xd   :  { %v62_v5 = vld [vmem:[#allocation6 + $0x50] sm:$0xff]  ;;  %v61_v6 = vld [vmem:[#allocation6 + $0x48] sm:$0xff]  ;;  %v60_v7 = vld [vmem:[#allocation6 + $0x40] sm:$0xff] }
   0xe   :  { %69 = vmatpush.msra.mxu0 %v66_v1  ;;  %v59_v8 = vld [vmem:[#allocation6 + $0x38] sm:$0xff]  ;;  %v58_v9 = vld [vmem:[#allocation6 + $0x30] sm:$0xff]  ;;  %v57_v10 = vld [vmem:[#allocation6 + $0x28] sm:$0xff] }
   0xf   :  { %v56_v11 = vld [vmem:[#allocation6 + $0x20] sm:$0xff]  ;;  %v55_v12 = vld [vmem:[#allocation6 + $0x18] sm:$0xff]  ;;  %v54_v13 = vld [vmem:[#allocation6 + $0x10] sm:$0xff] }
  0x10   :  { %70 = vmatpush.msra.mxu0 %v65_v2  ;;  %v53_v14 = vld [vmem:[#allocation6 + $0x8] sm:$0xff]  ;;  %v52_v15 = vld [vmem:[#allocation6] sm:$0xff]  ;;  %v51_v16 = vld [vmem:[#allocation3] sm:$0xff] }
  0x11   :  { %v123_v17 = vld [vmem:[%s241_s2] ss:$0 sm:$0xff] }
  0x12   :  { %71 = vmatpush.msra.mxu0 %v64_v3 }
  0x14   :  { %72 = vmatpush.msra.mxu0 %v63_v4 }
  0x16   :  { %73 = vmatpush.msra.mxu0 %v62_v5 }
  0x18   :  { %74 = vmatpush.msra.mxu0 %v61_v6 }
  0x1a   :  { %75 = vmatpush.msra.mxu0 %v60_v7 }
  0x1c   :  { %76 = vmatpush.msra.mxu0 %v59_v8 }
  0x1e   :  { %77 = vmatpush.msra.mxu0 %v58_v9 }
  0x20   :  { %78 = vmatpush.msra.mxu0 %v57_v10 }
  0x22   :  { %79 = vmatpush.msra.mxu0 %v56_v11 }
  0x24   :  { %80 = vmatpush.msra.mxu0 %v55_v12 }
  0x26   :  { %81 = vmatpush.msra.mxu0 %v54_v13 }
  0x28   :  { %82 = vmatpush.msra.mxu0 %v53_v14 }
  0x2a   :  { %83 = vmatpush.msra.mxu0 %v52_v15 }
  0x2b   :  { %84 = vmatmul.f32.vlgmr.msra.gmra.mxu0 %v51_v16 }
  0xa8   :  { %v85_v18 = vpop.f32.mrf.mxu0 }
  0xa9   :  { %v98_v19 = vadd.f32 %v123_v17, %v85_v18 }
  0xab   :  { %99 = vst [vmem:[#allocation8] sm:$0xff] %v98_v19 }
  0xac   :  { %110 = dma.vmem_to_hbm [thread:$0]  %s106_s25, 128, %s108_s28, [#allocation5]  }
  0xad   :  { %200 = dma.done.wait [#allocation5], 128  }
  0xae   :  { %201 = vsyncadd [#allocation5], 4294967168 }
  0xaf   :  { %115 = vsyncpa [#allocation4], 1 }
  0xb0   :  { %116 = vsyncpa [#allocation7], 1 }
  0xb1   :  { %117 = vsyncpa [#allocation5], 1 }

</bundles_post_ra>
